<compile_context>
chip_gen: v7x
topology: tpu7x:2x2x1
jax: 0.10.0
libtpu: 0.0.40
codegen_flags: <defaults>
</compile_context>

<pallas_src>
import jax
import jax.numpy as jnp
from jax.experimental import pallas as pl
from jax.experimental.pallas import tpu as pltpu


def _round_up(x, m):
    return ((x + m - 1) // m) * m


def _make_kernel(vocabs, dims, tb, total_dim_pad):
    num_features = len(dims)

    def kernel(idx_ref, *refs):
        # idx_ref    : VMEM (TB, F) int32 batch-tile of categorical indices.
        # refs[:F]   : resident embedding tables, VMEM (vocab_f, dim_f).
        # refs[F]    : output block, VMEM (TB, total_dim_pad).
        table_refs = refs[:num_features]
        o_ref = refs[num_features]

        idx_block = idx_ref[...]                      # (TB, F)
        pieces = []
        for f in range(num_features):
            tab = table_refs[f][...]                  # (vocab_f, dim_f)
            idx_f = idx_block[:, f:f + 1]             # (TB, 1)
            iota = jax.lax.broadcasted_iota(jnp.int32, (tb, vocabs[f]), 1)
            one_hot = (idx_f == iota).astype(tab.dtype)   # (TB, vocab_f)
            pieces.append(
                jnp.dot(one_hot, tab, preferred_element_type=jnp.float32))
        h = jnp.concatenate(pieces, axis=1)           # (TB, total_dim)
        pad_cols = total_dim_pad - h.shape[1]
        if pad_cols:
            h = jnp.concatenate(
                [h, jnp.zeros((tb, pad_cols), h.dtype)], axis=1)
        o_ref[...] = h.astype(o_ref.dtype)            # single lane-dense store

    return kernel


def feature_extractor(category_inputs, tables, *, tile_rows=256):
    """category_inputs: (B, F) integer; tables[f]: (vocab_f, dim_f).

    Returns (B, sum_f dim_f), matching
    torch.cat([emb_f(category_inputs[:, f]) for f in range(F)], dim=1).
    """
    B, F = category_inputs.shape
    assert F == len(tables)
    vocabs = tuple(int(t.shape[0]) for t in tables)
    dims = tuple(int(t.shape[1]) for t in tables)
    total_dim = sum(dims)
    total_dim_pad = _round_up(total_dim, 128)
    out_dtype = jnp.result_type(*[t.dtype for t in tables])

    # Batch tile: multiple of 8 sublanes, capped at tile_rows.
    tb = min(int(tile_rows), _round_up(B, 8))
    b_pad = _round_up(B, tb)

    idx = category_inputs.astype(jnp.int32)
    if b_pad != B:
        idx = jnp.pad(idx, ((0, b_pad - B), (0, 0)))  # pad rows -> index 0 (valid)

    in_specs = [pl.BlockSpec((tb, F), lambda i: (i, 0))]
    for f in range(F):
        # Full-table block, constant index_map -> DMA'd once, stays resident.
        in_specs.append(pl.BlockSpec((vocabs[f], dims[f]), lambda i: (0, 0)))
    out_spec = pl.BlockSpec((tb, total_dim_pad), lambda i: (i, 0))

    out = pl.pallas_call(
        _make_kernel(vocabs, dims, tb, total_dim_pad),
        out_shape=jax.ShapeDtypeStruct((b_pad, total_dim_pad), out_dtype),
        grid=(b_pad // tb,),
        in_specs=in_specs,
        out_specs=out_spec,
        compiler_params=pltpu.CompilerParams(
            dimension_semantics=("parallel",)),
    )(idx, *[t.astype(out_dtype) for t in tables])

    return out[:B, :total_dim]


def _reference(category_inputs, tables):
    return jnp.concatenate(
        [tables[f][category_inputs[:, f]] for f in range(len(tables))], axis=1
    )


if __name__ == "__main__":
    key = jax.random.PRNGKey(0)

    # (unique categories, embedding dim) per categorical feature.
    embedding_sizes = [(10, 8), (7, 4), (23, 16)]
    F = len(embedding_sizes)
    total_dim = sum(d for _, d in embedding_sizes)

    keys = jax.random.split(key, 2 * F)
    tables = []
    for f, (vocab, dim) in enumerate(embedding_sizes):
        tables.append(jax.random.normal(keys[2 * f], (vocab, dim), jnp.float32))

    ok = True
    # Small batch (single grid step, tb == B_pad) and a batch that exercises
    # padding + a multi-step grid.
    for batch in (8, 300):
        cols = []
        for f, (vocab, _) in enumerate(embedding_sizes):
            ck = jax.random.fold_in(keys[2 * f + 1], batch)
            cols.append(jax.random.randint(ck, (batch,), 0, vocab, jnp.int32))
        category_inputs = jnp.stack(cols, axis=1)  # (B, F) int32

        out = feature_extractor(category_inputs, tables)
        out = jax.block_until_ready(out)

        ref = _reference(category_inputs, tables)
        ok &= out.shape == (batch, total_dim)
        ok &= bool(jnp.allclose(out, ref, atol=1e-6, rtol=1e-6))

    assert ok, "mismatch vs reference"
    print("KERNEL_OK")
</pallas_src>

<mosaic_0001>
module attributes {stable_mosaic.version = 11 : i64} {
  func.func @kernel(%arg0: i32, %arg1: memref<8x3xi32, #tpu.memory_space<vmem>>, %arg2: memref<10x8xf32, #tpu.memory_space<vmem>>, %arg3: memref<7x4xf32, #tpu.memory_space<vmem>>, %arg4: memref<23x16xf32, #tpu.memory_space<vmem>>, %arg5: memref<8x128xf32, #tpu.memory_space<vmem>>) attributes {dimension_semantics = [#tpu.dimension_semantics<parallel>], iteration_bounds = array<i64: 1>, scalar_prefetch = 0 : i64, scratch_operands = 0 : i64, tpu.core_type = #tpu.core_type<tc>, window_params = [{transform_indices = @transform_0, window_bounds = array<i64: 8, 3>}, {pipeline_mode = #tpu.pipeline_mode<synchronous>, transform_indices = @transform_1, window_bounds = array<i64: 10, 8>}, {pipeline_mode = #tpu.pipeline_mode<synchronous>, transform_indices = @transform_2, window_bounds = array<i64: 7, 4>}, {pipeline_mode = #tpu.pipeline_mode<synchronous>, transform_indices = @transform_3, window_bounds = array<i64: 23, 16>}, {transform_indices = @transform_4, window_bounds = array<i64: 8, 128>}]} {
    %c0 = arith.constant 0 : index
    %c0_0 = arith.constant 0 : index
    %0 = vector.load %arg1[%c0, %c0_0] : memref<8x3xi32, #tpu.memory_space<vmem>>, vector<8x3xi32>
    %c0_1 = arith.constant 0 : index
    %c0_2 = arith.constant 0 : index
    %1 = vector.load %arg2[%c0_1, %c0_2] : memref<10x8xf32, #tpu.memory_space<vmem>>, vector<10x8xf32>
    %2 = vector.extract_strided_slice %0 {offsets = [0, 0], sizes = [8, 1], strides = [1, 1]} : vector<8x3xi32> to vector<8x1xi32>
    %3 = tpu.iota {dimensions = array<i32: 1>} : vector<8x10xi32>
    %4 = vector.broadcast %2 : vector<8x1xi32> to vector<8x10xi32>
    %5 = arith.cmpi eq, %4, %3 : vector<8x10xi32>
    %6 = arith.extui %5 : vector<8x10xi1> to vector<8x10xi32>
    %7 = arith.sitofp %6 : vector<8x10xi32> to vector<8x10xf32>
    %cst = arith.constant dense<0.000000e+00> : vector<8x8xf32>
    %8 = tpu.matmul %7, %1, %cst {dimension_numbers = #tpu.dot_dimension_numbers<[1], [0], [0], [1], [0, 0, 1, 1], [], []>} : vector<8x10xf32>, vector<10x8xf32>, vector<8x8xf32> -> vector<8x8xf32>
    %c0_3 = arith.constant 0 : index
    %c0_4 = arith.constant 0 : index
    %9 = vector.load %arg3[%c0_3, %c0_4] : memref<7x4xf32, #tpu.memory_space<vmem>>, vector<7x4xf32>
    %10 = vector.extract_strided_slice %0 {offsets = [0, 1], sizes = [8, 1], strides = [1, 1]} : vector<8x3xi32> to vector<8x1xi32>
    %11 = tpu.iota {dimensions = array<i32: 1>} : vector<8x7xi32>
    %12 = vector.broadcast %10 : vector<8x1xi32> to vector<8x7xi32>
    %13 = arith.cmpi eq, %12, %11 : vector<8x7xi32>
    %14 = arith.extui %13 : vector<8x7xi1> to vector<8x7xi32>
    %15 = arith.sitofp %14 : vector<8x7xi32> to vector<8x7xf32>
    %cst_5 = arith.constant dense<0.000000e+00> : vector<8x4xf32>
    %16 = tpu.matmul %15, %9, %cst_5 {dimension_numbers = #tpu.dot_dimension_numbers<[1], [0], [0], [1], [0, 0, 1, 1], [], []>} : vector<8x7xf32>, vector<7x4xf32>, vector<8x4xf32> -> vector<8x4xf32>
    %c0_6 = arith.constant 0 : index
    %c0_7 = arith.constant 0 : index
    %17 = vector.load %arg4[%c0_6, %c0_7] : memref<23x16xf32, #tpu.memory_space<vmem>>, vector<23x16xf32>
    %18 = vector.extract_strided_slice %0 {offsets = [0, 2], sizes = [8, 1], strides = [1, 1]} : vector<8x3xi32> to vector<8x1xi32>
    %19 = tpu.iota {dimensions = array<i32: 1>} : vector<8x23xi32>
    %20 = vector.broadcast %18 : vector<8x1xi32> to vector<8x23xi32>
    %21 = arith.cmpi eq, %20, %19 : vector<8x23xi32>
    %22 = arith.extui %21 : vector<8x23xi1> to vector<8x23xi32>
    %23 = arith.sitofp %22 : vector<8x23xi32> to vector<8x23xf32>
    %cst_8 = arith.constant dense<0.000000e+00> : vector<8x16xf32>
    %24 = tpu.matmul %23, %17, %cst_8 {dimension_numbers = #tpu.dot_dimension_numbers<[1], [0], [0], [1], [0, 0, 1, 1], [], []>} : vector<8x23xf32>, vector<23x16xf32>, vector<8x16xf32> -> vector<8x16xf32>
    %25 = tpu.concatenate %8, %16, %24 in 1 : vector<8x8xf32>, vector<8x4xf32>, vector<8x16xf32> -> vector<8x28xf32>
    %cst_9 = arith.constant 0.000000e+00 : f32
    %26 = vector.broadcast %cst_9 : f32 to vector<8x100xf32>
    %27 = tpu.concatenate %25, %26 in 1 : vector<8x28xf32>, vector<8x100xf32> -> vector<8x128xf32>
    %c0_10 = arith.constant 0 : index
    %c0_11 = arith.constant 0 : index
    %28 = vector.load %arg5[%c0_10, %c0_11] : memref<8x128xf32, #tpu.memory_space<vmem>>, vector<8x128xf32>
    tpu.vector_store %arg5[%c0_10, %c0_11], %27 {strides = array<i32>} : memref<8x128xf32, #tpu.memory_space<vmem>>, vector<8x128xf32>,
    return
  }
  func.func @transform_0(%arg0: i32) -> (i32, i32) {
    %c0_i32 = arith.constant 0 : i32
    %c0_i32_0 = arith.constant 0 : i32
    return %arg0, %c0_i32 : i32, i32
  }
  func.func @transform_1(%arg0: i32) -> (i32, i32) {
    %c0_i32 = arith.constant 0 : i32
    %c0_i32_0 = arith.constant 0 : i32
    %c0_i32_1 = arith.constant 0 : i32
    return %c0_i32, %c0_i32_0 : i32, i32
  }
  func.func @transform_2(%arg0: i32) -> (i32, i32) {
    %c0_i32 = arith.constant 0 : i32
    %c0_i32_0 = arith.constant 0 : i32
    %c0_i32_1 = arith.constant 0 : i32
    return %c0_i32, %c0_i32_0 : i32, i32
  }
  func.func @transform_3(%arg0: i32) -> (i32, i32) {
    %c0_i32 = arith.constant 0 : i32
    %c0_i32_0 = arith.constant 0 : i32
    %c0_i32_1 = arith.constant 0 : i32
    return %c0_i32, %c0_i32_0 : i32, i32
  }
  func.func @transform_4(%arg0: i32) -> (i32, i32) {
    %c0_i32 = arith.constant 0 : i32
    %c0_i32_0 = arith.constant 0 : i32
    return %arg0, %c0_i32 : i32, i32
  }
}

</mosaic_0001>

<bundles_post_ra>
// kernel: tpu_custom_call.1
= control target key start
LH: loop header
LB: loop body
LE: loop exit
PB: predicated region body
PF: predicated region fallthrough
CT: control target
= control target key end

     0   :  { %v390_v1 = vmov 1   ;;  %v391_v2 = vmov 0   ;;  %vm118_vm0 = vcmask 1046528   ;;  %s463_s0 = inlined_call_operand.vmem [shape: s32[8,3], index: 0, kind: input, shape index: {}]   ;;  %s464_s1 = inlined_call_operand.vmem [shape: f32[10,8], index: 1, kind: input, shape index: {}]   ;;  %s465_s2 = inlined_call_operand.vmem [shape: f32[7,4], index: 2, kind: input, shape index: {}]   ;;  %s466_s3 = inlined_call_operand.vmem [shape: f32[23,16], index: 3, kind: input, shape index: {}]   ;;  %s467_s4 = inlined_call_operand.hbm [shape: f32[8,128], index: 4, kind: output, shape index: {}]  }
   0x1   :  { %v18_v0 = vld [vmem:[%s463_s0] sm:$0xff]  ;;  %363 = vset.pattern.permute.xlu0 %v390_v1  ;;  %365 = vset.pattern.permute.xlu1 %v391_v2 }
   0x2   :  { %v107_v3 = vld [vmem:[%s465_s2] sm:$0x7f]  ;;  %109 = vperm.xlu0 %363, %v18_v0   ;;  %24 = vperm.xlu1 %365, %v18_v0  }
   0x3   :  { %9 = vsyncpa [#allocation3], 0  ;;  %v392_v4 = vmov 0.0   ;;  %vm393_vm1 = vmmov 0   ;;  %v394_v5 = vmov 0.0|0.0   ;;  %v395_v6 = vmov 2  }
   0x4   :  { %332 = vmatprep.subr.mxu1 %v392_v4  ;;  %334 = vmatprep.mubr.msk.f32.mxu1 %vm393_vm1, %v392_v4  ;;  %v19_v7 = vld [vmem:[%s464_s1] sm:$0xff]  ;;  %v20_v8 = vld [vmem:[%s464_s1 + $0x8] sm:$0x3]  ;;  %vm33_vm2 = vcmask 1041408   ;;  %vm396_vm3 = vmmov 1   ;;  %v21_v10 = vlaneseq  ;;  %vm114_vm5 = vcmask 56320  }
   0x5   :  { %333 = vmatpush3.msk.msra.mxu1 %vm118_vm0, %v107_v3  ;;  %346 = vmatprep.subr.bf16.mxu0 %v394_v5  ;;  %v347_v9 = vpack.c.bf16 %v20_v8, %v19_v7  ;;  %vm348_vm4 = vmpackc.low %vm33_vm2, %vm396_vm3  ;;  %v192_v12 = vld [vmem:[%s466_s3] sm:$0xff]  ;;  %v193_v13 = vld [vmem:[%s466_s3 + $0x8] sm:$0xff]  ;;  %vm29_vm6 = vcmask 80896   ;;  %vm201_vm10 = vcmask 187392   ;;  %s397_s26 = smov 8   ;;  %s398_s27 = smov 12  }
   0x6   :  { %350 = vmatprep.subr.bf16.mxu1 %v394_v5  ;;  %329 = vmatprep.mubr.msk.f32.mxu0 %vm393_vm1, %v392_v4  ;;  %v22_v11 = vand.u32 127, %v21_v10  ;;  %v351_v15 = vpack.c.bf16 %v193_v13, %v192_v12  ;;  %v194_v20 = vld [vmem:[%s466_s3 + $0x10] sm:$0x7f]  ;;  %vm286_vm11 = vcmask 64512   ;;  %vm288_vm12 = vcmask 97280   ;;  %s399_s3 = smov [#allocation2]  }
   0x7   :  { %364 = vset.pattern.permute.xlu0 %v395_v6  ;;  %349 = vmatpush3.bf16.msk.msra.mxu0 %vm348_vm4, %v347_v9  ;;  %s299_s28 = sshll.u32 %s399_s3, 4  ;;  %vm290_vm13 = vcmask 228352   ;;  %s300_s28 = int_to_ptr.vmem [resolvable:$true] %s299_s28 }
   0x8   :  { %196 = vperm.xlu0 %364, %v18_v0   ;;  %s366_s29 = scalar_lea.vmem %s300_s28, 128  ;;  %p371_p1 = scmp.lt.s32.totalorder %s300_s28, %s300_s28 }
   0x9   :  { %p367_p0 = scmp.ne.s32.totalorder %s300_s28, %s366_s29  ;;  %p372_p2 = scmp.lt.s32.totalorder %s366_s29, %s366_s29 }
   0xb   :  { %p373_p3 = por %p372_p2, %p371_p1 }
   0xd   :  { %p374_p4 = pnand %p373_p3, %p367_p0 }
  0x81   :  { %v110_v14 = vpop.permute.xlu0 %109  ;;  %v25_v16 = vpop.permute.xlu1 %24 }
  0x82   :  { %vm111_vm7 = vcmp.eq.s32.totalorder %v110_v14, %v22_v11  ;;  %vm26_vm8 = vcmp.eq.s32.totalorder %v25_v16, %v22_v11 }
  0x83   :  { %v310_v17 = vsel %vm111_vm7, 1.0, %v392_v4  ;;  %v307_v18 = vsel %vm26_vm8, 1.0, %v392_v4 }
  0x84   :  { %335 = vmatmul.mubr.msk.f32.vlgmr.msra.gmra.mrb[0].mxu1 %vm114_vm5, %v310_v17  ;;  %330 = vmatmul.mubr.msk.f32.vlgmr.msra.gmra.mrb[0].mxu0 %vm29_vm6, %v307_v18 }
  0x85   :  { %352 = vmatpush3.bf16.msra.mxu1 %v351_v15  ;;  %343 = vmatprep.mubr.msk.f32.mxu1 %vm393_vm1, %v392_v4 }
  0x86   :  { %341 = vmatprep.subr.mxu1 %v392_v4 }
  0x87   :  { %v197_v19 = vpop.permute.xlu0 %196 }
  0x88   :  { %vm198_vm9 = vcmp.eq.s32.totalorder %v197_v19, %v22_v11 }
  0x89   :  { %v313_v21 = vsel %vm198_vm9, 1.0, %v392_v4  ;;  %342 = vmatpush3.msk.msra.mxu1 %vm118_vm0, %v194_v20 }
  0x8a   :  { %344 = vmatmul.mubr.msk.f32.vlgmr.msra.gmra.mrb[2].mxu1 %vm201_vm10, %v313_v21 }
 0x157   :  { %v188_v22 = vpop.f32.mrb[0].mxu1  ;;  %v103_v23 = vpop.f32.mrb[0].mxu0 }
 0x158   :  { %279 = vrot.lane.b32.xlu1 %v188_v22, %s397_s26  ;;  %v336_v24 = vpop.f32.mrb[1].mxu1  ;;  %v331_v25 = vpop.f32.mrb[1].mxu0 }
 0x15d   :  { %v274_v26 = vpop.f32.mrb[2].mxu1 }
 0x15e   :  { %283 = vrot.lane.b32.xlu1 %v274_v26, %s398_s27  ;;  %v345_v27 = vpop.f32.mrb[3].mxu1 }
 0x1ca   :  { %v280_v28 = vpop.permute.xlu1 %279 }
 0x1cb   :  { %v287_v29 = vsel %vm286_vm11, %v103_v23, %v280_v28 }
 0x1d0   :  { %v284_v30 = vpop.permute.xlu1 %283 }
 0x1d1   :  { %v289_v31 = vsel %vm288_vm12, %v287_v29, %v284_v30 }
 0x1d2   :  { %v291_v32 = vsel %vm290_vm13, %v289_v31, 0.0 }
 0x1d3   :  { %292 = vst [vmem:[#allocation2] sm:$0xff] %v291_v32 }
 0x1d4   :  { %377 = shalt.err (!%p374_p4)
}
 0x1d5   :  { %s378_s6 = scalar_lea.hbm %s467_s4, 128 }
 0x1d6   :  { %p379_p5 = scmp.ne.s32.totalorder %s467_s4, %s378_s6  ;;  %p382_p6 = scmp.lt.u32.totalorder %s378_s6, %s467_s4 }
 0x1d8   :  { %p384_p7 = pnand %p382_p6, %p379_p5 }
 0x1da   :  { %387 = shalt.err (!%p384_p7)
}
 0x1db   :  { %302 = dma.vmem_to_hbm [thread:$0]  %s300_s28, 128, %s467_s4, [#allocation3]  }
 0x1dc   :  { %388 = dma.done.wait [#allocation3], 128  }
 0x1dd   :  { %389 = vsyncadd [#allocation3], 4294967168 }
 0x1de   :  { %306 = vsyncpa [#allocation3], 1 }

</bundles_post_ra>
